<compile_context>
chip_gen: v7x
topology: tpu7x:2x2x1
jax: 0.10.0
libtpu: 0.0.40
codegen_flags: <defaults>
</compile_context>

<pallas_src>
import math
from typing import Any, NamedTuple

import jax
import jax.numpy as jnp
from jax.experimental import pallas as pl
from jax.experimental.pallas import tpu as pltpu


def _round_up(n, m):
    return ((n + m - 1) // m) * m


# Tile ladders (hardware aligned: lane dims multiples of 128, batch-tile
# multiples of 16 so bf16 (16, 128) sub-tiling is always legal).
_TB_LADDER = (1024, 768, 512, 384, 256, 128, 64, 32, 16)
_TN_LADDER = (2048, 1536, 1024, 768, 512, 384, 256, 128)
_TK_LADDER = (1024, 768, 512, 384, 256, 128)


def _pick_tile(extent, ladder, cap):
    """`extent` is already hw-aligned; choose a tile <= cap minimizing padding."""
    if extent <= cap:
        return extent                      # single block, zero padding waste
    best_t, best_waste = None, None
    for t in ladder:
        if t > cap:
            continue
        waste = (-extent) % t
        if best_waste is None or waste < best_waste:
            best_t, best_waste = t, waste
    return best_t if best_t is not None else cap


def _chip_budgets():
    """Per-generation tile caps / VMEM budget (robust fallback if query fails)."""
    vmem = None
    try:
        info = pltpu.get_tpu_info()
        vmem = getattr(info, "vmem_capacity_bytes", None)
    except Exception:
        vmem = None
    if vmem is not None and vmem >= (100 << 20):
        # v5e / v6e: 128 MiB VMEM, 1 TensorCore, bandwidth-starved -> big tiles
        # to cut repeated-operand HBM traffic.
        return dict(tb_cap=512, tn_cap=2048, tk_cap=1024,
                    vmem_budget=96 << 20, dual_core_hint=False)
    # v7x (64 MiB VMEM, 2 TCs/chip) or unknown: conservative caps; prefer
    # >= 2 parallel output blocks so both TensorCores get work.
    return dict(tb_cap=512, tn_cap=1024, tk_cap=512,
                vmem_budget=48 << 20, dual_core_hint=True)


# ---------------------------------------------------------------------------
# Kernels
# ---------------------------------------------------------------------------

def _share_kernel_f32_out(x_ref, w_ref, b_ref, o_ref):
    # x_ref: (tb, tk)  w_ref: (tk, tn)  b_ref: (1, tn)  o_ref: (tb, tn) f32
    # Output block is resident across the k axis -> accumulate directly into it
    # (no scratch, no epilogue copy).
    k = pl.program_id(2)

    @pl.when(k == 0)
    def _():
        o_ref[...] = jnp.zeros_like(o_ref)

    o_ref[...] += jnp.dot(x_ref[...], w_ref[...],
                          preferred_element_type=jnp.float32)

    @pl.when(k == pl.num_programs(2) - 1)
    def _():
        o_ref[...] = jnp.maximum(o_ref[...] + b_ref[...].astype(jnp.float32), 0.0)


def _share_kernel_acc(x_ref, w_ref, b_ref, o_ref, acc_ref):
    # Same contraction, but with an f32 VMEM accumulator for non-f32 outputs.
    k = pl.program_id(2)

    @pl.when(k == 0)
    def _():
        acc_ref[...] = jnp.zeros_like(acc_ref)

    acc_ref[...] += jnp.dot(x_ref[...], w_ref[...],
                            preferred_element_type=jnp.float32)

    @pl.when(k == pl.num_programs(2) - 1)
    def _():
        out = acc_ref[...] + b_ref[...].astype(jnp.float32)
        o_ref[...] = jnp.maximum(out, 0.0).astype(o_ref.dtype)


# ---------------------------------------------------------------------------
# Parameter preparation (do ONCE per weight; hoists pad / transpose / cast out
# of the per-call forward path).
# ---------------------------------------------------------------------------

class ShareParams(NamedTuple):
    weight: jax.Array        # (Kp, Hp)  transposed, padded, compute dtype
    bias: jax.Array          # (1, Hp)   float32, padded
    d_in: int
    h: int
    tn: int
    tk: int
    tb_cap: int
    vmem_budget: int
    compute_dtype: Any


def prepare_share_params(weight, bias, *, compute_dtype=jnp.bfloat16,
                         tn=None, tk=None, split_h_for_dual_core=None):
    """weight: (H, D_in) PyTorch nn.Linear layout; bias: (H,)."""
    H, D_in = weight.shape
    budgets = _chip_budgets()
    Kp128 = _round_up(D_in, 128)
    Hp128 = _round_up(H, 128)

    if tk is None:
        tk = _pick_tile(Kp128, _TK_LADDER, budgets["tk_cap"])
    if tn is None:
        tn = _pick_tile(Hp128, _TN_LADDER, budgets["tn_cap"])
        if split_h_for_dual_core is None:
            split_h_for_dual_core = budgets["dual_core_hint"]
        # v7x dual-TC hint: if H fits one tile, split it in two (only when the
        # split adds zero padding) so the two "parallel" output blocks can run
        # on both TensorCores even at batch-tile count 1.
        if (split_h_for_dual_core and tn == Hp128
                and Hp128 >= 256 and Hp128 % 256 == 0):
            tn = Hp128 // 2
    assert tn % 128 == 0 and tk % 128 == 0, "tn/tk must be multiples of 128"

    Kp = _round_up(Kp128, tk)
    Hp = _round_up(Hp128, tn)

    # One-time: cast -> transpose to (D_in, H) -> pad.  Keeping the contraction
    # dim first means the kernel's jnp.dot needs no per-tile transpose (no XLU
    # traffic competing with MXU pushes).
    w = weight.astype(compute_dtype).T
    if (Kp, Hp) != (D_in, H):
        w = jnp.pad(w, ((0, Kp - D_in), (0, Hp - H)))
    b = bias.astype(jnp.float32).reshape(1, H)
    if Hp != H:
        b = jnp.pad(b, ((0, 0), (0, Hp - H)))

    return ShareParams(w, b, D_in, H, tn, tk,
                       budgets["tb_cap"], budgets["vmem_budget"], compute_dtype)


# ---------------------------------------------------------------------------
# Forward
# ---------------------------------------------------------------------------

def share_forward(x, params: ShareParams, *, tb=None, out_dtype=None):
    """ReLU(x @ weight.T + bias) with params from prepare_share_params.

    x: (..., D_in)  ->  (..., H), dtype = out_dtype (default: x.dtype).
    """
    lead = x.shape[:-1]
    D_in = x.shape[-1]
    if D_in != params.d_in:
        raise ValueError(f"expected last dim {params.d_in}, got {D_in}")
    out_dtype = jnp.dtype(out_dtype) if out_dtype is not None else jnp.dtype(x.dtype)

    x2 = x.reshape(-1, D_in).astype(params.compute_dtype)
    B = x2.shape[0]
    Kp, Hp = params.weight.shape
    tn, tk = params.tn, params.tk

    Bp16 = _round_up(max(B, 1), 16)
    if tb is None:
        tb = _pick_tile(Bp16, _TB_LADDER, params.tb_cap)
    assert tb % 16 == 0 or tb == Bp16
    Bp = _round_up(Bp16, tb)

    if (Bp, Kp) != (B, D_in):
        # Zero K-padding is exact for the contraction; padded B rows are
        # sliced off below.
        x2 = jnp.pad(x2, ((0, Bp - B), (0, Kp - D_in)))

    grid = (Bp // tb, Hp // tn, Kp // tk)
    f32_out = out_dtype == jnp.dtype(jnp.float32)

    cdt_size = jnp.dtype(params.compute_dtype).itemsize
    out_size = out_dtype.itemsize

    # VMEM footprint (double-buffered operands/output + optional accumulator)
    # -> compiler limit with headroom, capped per generation.
    footprint = (2 * (tb * tk * cdt_size + tk * tn * cdt_size + tb * tn * out_size)
                 + (0 if f32_out else tb * tn * 4) + 2 * tn * 4)
    vmem_limit = int(min(max(footprint + (8 << 20), 32 << 20), params.vmem_budget))

    # Advisory cost: padded flops, and bytes including operand re-fetch
    # (x refetched once per H-block, weight/bias once per B-block).
    cost = pl.CostEstimate(
        flops=2 * Bp * Kp * Hp,
        transcendentals=0,
        bytes_accessed=int(x2.size * cdt_size * grid[1]
                           + params.weight.size * cdt_size * grid[0]
                           + params.bias.size * 4 * grid[0]
                           + Bp * Hp * out_size))

    in_specs = [
        pl.BlockSpec((tb, tk), lambda i, j, k: (i, k)),   # x tile
        pl.BlockSpec((tk, tn), lambda i, j, k: (k, j)),   # weight tile (Kp, Hp)
        pl.BlockSpec((1, tn), lambda i, j, k: (0, j)),    # bias (not re-fetched over k)
    ]
    out_spec = pl.BlockSpec((tb, tn), lambda i, j, k: (i, j))

    if f32_out:
        kernel = _share_kernel_f32_out
        scratch = []
    else:
        kernel = _share_kernel_acc
        scratch = [pltpu.VMEM((tb, tn), jnp.float32)]

    out = pl.pallas_call(
        kernel,
        out_shape=jax.ShapeDtypeStruct((Bp, Hp), out_dtype),
        grid_spec=pltpu.PrefetchScalarGridSpec(
            num_scalar_prefetch=0,
            grid=grid,
            in_specs=in_specs,
            out_specs=out_spec,
            scratch_shapes=scratch,
        ),
        compiler_params=pltpu.CompilerParams(
            dimension_semantics=("parallel", "parallel", "arbitrary"),
            vmem_limit_bytes=vmem_limit),
        cost_estimate=cost,
    )(x2, params.weight, params.bias)

    out = out[:B, :params.h]
    return out.reshape(*lead, params.h)


def init_share_params(key, d_in, hidden1, dtype=jnp.float32):
    """Deterministic init mirroring nn.Linear default (uniform +/- 1/sqrt(d_in))."""
    kw, kb = jax.random.split(key)
    bound = 1.0 / math.sqrt(d_in)
    weight = jax.random.uniform(kw, (hidden1, d_in), dtype=dtype,
                                minval=-bound, maxval=bound)
    bias = jax.random.uniform(kb, (hidden1,), dtype=dtype,
                              minval=-bound, maxval=bound)
    return weight, bias


# TODO(synk): MetaModule's parameter-surgery helpers (update_params/set_param,
# meta-learning inner loops) are training-time machinery with no forward-pass
# Pallas equivalent; only the forward (Linear + ReLU) is implemented here.

if __name__ == "__main__":
    key = jax.random.PRNGKey(0)
    k_x, k_p, k_x2, k_p2 = jax.random.split(key, 4)

    # ---- Case 1: module-sized tiny shapes (input=32, hidden1=64) ----
    B, D_IN, HIDDEN1 = 8, 32, 64        # hidden2 is unused by the module
    x = jax.random.normal(k_x, (B, D_IN), dtype=jnp.float32)
    weight, bias = init_share_params(k_p, D_IN, HIDDEN1)
    ref = jnp.maximum(x @ weight.T + bias, 0.0)

    # Exact f32 compute path (tight tolerance); exercises the scratch-free
    # f32-output kernel.
    p_f32 = prepare_share_params(weight, bias, compute_dtype=jnp.float32)
    out_f32 = jax.block_until_ready(share_forward(x, p_f32))
    assert out_f32.shape == (B, HIDDEN1)
    assert jnp.allclose(out_f32, ref, atol=1e-5, rtol=1e-5)

    # Default path: bf16 operands, f32 accumulation, f32 output.
    p_bf16 = prepare_share_params(weight, bias)
    out_def = jax.block_until_ready(share_forward(x, p_bf16)).astype(jnp.float32)
    assert jnp.allclose(out_def, ref, atol=5e-2, rtol=5e-2)

    # bf16 output path (exercises the f32-accumulator kernel variant).
    out_b16 = jax.block_until_ready(
        share_forward(x, p_bf16, out_dtype=jnp.bfloat16))
    assert out_b16.dtype == jnp.bfloat16
    assert jnp.allclose(out_b16.astype(jnp.float32), ref, atol=5e-2, rtol=5e-2)

    # ---- Case 2: forced small tiles -> multi-block (B,H,K) grid with a real
    # K reduction, still small shapes. grid = (3, 2, 2). ----
    B2, D2, H2 = 48, 256, 256
    x2 = jax.random.normal(k_x2, (B2, D2), dtype=jnp.float32)
    w2, b2 = init_share_params(k_p2, D2, H2)
    ref2 = jnp.maximum(x2 @ w2.T + b2, 0.0)
    p2 = prepare_share_params(w2, b2, compute_dtype=jnp.float32, tn=128, tk=128)
    out2 = jax.block_until_ready(share_forward(x2, p2, tb=16))
    assert out2.shape == (B2, H2)
    assert jnp.allclose(out2, ref2, atol=1e-4, rtol=1e-4)

    print("KERNEL_OK")
</pallas_src>

<mosaic_0001>
module attributes {stable_mosaic.version = 11 : i64} {
  func.func @_share_kernel_f32_out(%arg0: i32, %arg1: i32, %arg2: i32, %arg3: memref<16x128xf32, #tpu.memory_space<vmem>>, %arg4: memref<128x128xf32, #tpu.memory_space<vmem>>, %arg5: memref<1x128xf32, #tpu.memory_space<vmem>>, %arg6: memref<16x128xf32, #tpu.memory_space<vmem>>) attributes {dimension_semantics = [#tpu.dimension_semantics<parallel>, #tpu.dimension_semantics<parallel>, #tpu.dimension_semantics<arbitrary>], iteration_bounds = array<i64: 1, 1, 1>, scalar_prefetch = 0 : i64, scratch_operands = 0 : i64, tpu.core_type = #tpu.core_type<tc>, window_params = [{transform_indices = @transform_0, window_bounds = array<i64: 16, 128>}, {transform_indices = @transform_1, window_bounds = array<i64: 128, 128>}, {transform_indices = @transform_2, window_bounds = array<i64: 1, 128>}, {transform_indices = @transform_3, window_bounds = array<i64: 16, 128>}]} {
    %c0_i32 = arith.constant 0 : i32
    %0 = arith.cmpi eq, %arg2, %c0_i32 : i32
    %1 = arith.extui %0 : i1 to i32
    %c0_i32_0 = arith.constant 0 : i32
    %2 = arith.cmpi ne, %1, %c0_i32_0 : i32
    scf.if %2 {
      %cst_10 = arith.constant 0.000000e+00 : f32
      %12 = vector.broadcast %cst_10 : f32 to vector<16x128xf32>
      %c0_11 = arith.constant 0 : index
      %c0_12 = arith.constant 0 : index
      %13 = vector.load %arg6[%c0_11, %c0_12] : memref<16x128xf32, #tpu.memory_space<vmem>>, vector<16x128xf32>
      tpu.vector_store %arg6[%c0_11, %c0_12], %12 {strides = array<i32>} : memref<16x128xf32, #tpu.memory_space<vmem>>, vector<16x128xf32>,
    } else {
    }
    %c0 = arith.constant 0 : index
    %c0_1 = arith.constant 0 : index
    %3 = vector.load %arg6[%c0, %c0_1] : memref<16x128xf32, #tpu.memory_space<vmem>>, vector<16x128xf32>
    %c0_2 = arith.constant 0 : index
    %c0_3 = arith.constant 0 : index
    %4 = vector.load %arg3[%c0_2, %c0_3] : memref<16x128xf32, #tpu.memory_space<vmem>>, vector<16x128xf32>
    %c0_4 = arith.constant 0 : index
    %c0_5 = arith.constant 0 : index
    %5 = vector.load %arg4[%c0_4, %c0_5] : memref<128x128xf32, #tpu.memory_space<vmem>>, vector<128x128xf32>
    %cst = arith.constant dense<0.000000e+00> : vector<16x128xf32>
    %6 = tpu.matmul %4, %5, %cst {dimension_numbers = #tpu.dot_dimension_numbers<[1], [0], [0], [1], [0, 0, 1, 1], [], []>} : vector<16x128xf32>, vector<128x128xf32>, vector<16x128xf32> -> vector<16x128xf32>
    %7 = arith.addf %3, %6 : vector<16x128xf32>
    %c0_6 = arith.constant 0 : index
    %c0_7 = arith.constant 0 : index
    %8 = vector.load %arg6[%c0_6, %c0_7] : memref<16x128xf32, #tpu.memory_space<vmem>>, vector<16x128xf32>
    tpu.vector_store %arg6[%c0_6, %c0_7], %7 {strides = array<i32>} : memref<16x128xf32, #tpu.memory_space<vmem>>, vector<16x128xf32>,
    %c0_i32_8 = arith.constant 0 : i32
    %9 = arith.cmpi eq, %arg2, %c0_i32_8 : i32
    %10 = arith.extui %9 : i1 to i32
    %c0_i32_9 = arith.constant 0 : i32
    %11 = arith.cmpi ne, %10, %c0_i32_9 : i32
    scf.if %11 {
      %c0_10 = arith.constant 0 : index
      %c0_11 = arith.constant 0 : index
      %12 = vector.load %arg6[%c0_10, %c0_11] : memref<16x128xf32, #tpu.memory_space<vmem>>, vector<16x128xf32>
      %c0_12 = arith.constant 0 : index
      %c0_13 = arith.constant 0 : index
      %13 = vector.load %arg5[%c0_12, %c0_13] : memref<1x128xf32, #tpu.memory_space<vmem>>, vector<1x128xf32>
      %14 = vector.broadcast %13 : vector<1x128xf32> to vector<16x128xf32>
      %15 = arith.addf %12, %14 : vector<16x128xf32>
      %cst_14 = arith.constant 0.000000e+00 : f32
      %16 = vector.broadcast %cst_14 : f32 to vector<16x128xf32>
      %17 = arith.maximumf %15, %16 : vector<16x128xf32>
      %c0_15 = arith.constant 0 : index
      %c0_16 = arith.constant 0 : index
      %18 = vector.load %arg6[%c0_15, %c0_16] : memref<16x128xf32, #tpu.memory_space<vmem>>, vector<16x128xf32>
      tpu.vector_store %arg6[%c0_15, %c0_16], %17 {strides = array<i32>} : memref<16x128xf32, #tpu.memory_space<vmem>>, vector<16x128xf32>,
    } else {
    }
    return
  }
  func.func @transform_0(%arg0: i32, %arg1: i32, %arg2: i32) -> (i32, i32) {
    %c0_i32 = arith.constant 0 : i32
    return %arg0, %arg2 : i32, i32
  }
  func.func @transform_1(%arg0: i32, %arg1: i32, %arg2: i32) -> (i32, i32) {
    %c0_i32 = arith.constant 0 : i32
    return %arg2, %arg1 : i32, i32
  }
  func.func @transform_2(%arg0: i32, %arg1: i32, %arg2: i32) -> (i32, i32) {
    %c0_i32 = arith.constant 0 : i32
    %c0_i32_0 = arith.constant 0 : i32
    return %c0_i32, %arg1 : i32, i32
  }
  func.func @transform_3(%arg0: i32, %arg1: i32, %arg2: i32) -> (i32, i32) {
    %c0_i32 = arith.constant 0 : i32
    return %arg0, %arg1 : i32, i32
  }
}

</mosaic_0001>

<bundles_post_ra>
// kernel: tpu_custom_call.1
= control target key start
LH: loop header
LB: loop body
LE: loop exit
PB: predicated region body
PF: predicated region fallthrough
CT: control target
= control target key end

     0   :  { %8 = vsyncpa [#allocation3], 0  ;;  %s421_s0 = inlined_call_operand.hbm [shape: f32[16,128], index: 0, kind: input, shape index: {}]   ;;  %s422_s1 = inlined_call_operand.hbm [shape: f32[128,128], index: 1, kind: input, shape index: {}]   ;;  %s423_s2 = inlined_call_operand.vmem [shape: f32[1,128], index: 2, kind: input, shape index: {}]   ;;  %s424_s3 = inlined_call_operand.hbm [shape: f32[16,128], index: 3, kind: output, shape index: {}]  }
   0x1   :  { %9 = vsyncpa [#allocation6], 0 }
   0x2   :  { %10 = vsyncpa [#allocation4], 0  ;;  %s348_s12 = smov [#allocation2]   ;;  %s276_s16 = scalar_lea.hbm %s421_s0, 256 }
   0x3   :  { %s16_s13 = sshll.u32 %s348_s12, 4  ;;  %p277_p0 = scmp.ne.s32.totalorder %s421_s0, %s276_s16  ;;  %s17_s13 = int_to_ptr.vmem [resolvable:$true] %s16_s13 }
   0x4   :  { %p280_p1 = scmp.lt.u32.totalorder %s276_s16, %s421_s0 }
   0x6   :  { %p282_p2 = pnand %p280_p1, %p277_p0 }
   0x8   :  { %285 = shalt.err (!%p282_p2)
}
   0x9   :  { %s286_s21 = scalar_lea.vmem %s17_s13, 256  ;;  %p291_p4 = scmp.lt.s32.totalorder %s17_s13, %s17_s13 }
   0xa   :  { %p287_p3 = scmp.ne.s32.totalorder %s17_s13, %s286_s21  ;;  %p292_p5 = scmp.lt.s32.totalorder %s286_s21, %s286_s21 }
   0xc   :  { %p293_p6 = por %p292_p5, %p291_p4 }
   0xe   :  { %p294_p7 = pnand %p293_p6, %p287_p3 }
  0x10   :  { %297 = shalt.err (!%p294_p7)
}
  0x11   :  { %s349_s22 = smov 128   ;;  %s350_s23 = smov 8  }
  0x12   :  { %22 = dma.hbm_to_vmem [thread:$0]  %s421_s0, 256, %s17_s13, [#allocation3], %s349_s22, %s349_s22, %s350_s23  }
  0x13   :  { %s351_s26 = smov [#allocation5]   ;;  %s298_s30 = scalar_lea.hbm %s422_s1, 2048 }
  0x14   :  { %s28_s27 = sshll.u32 %s351_s26, 4  ;;  %p299_p8 = scmp.ne.s32.totalorder %s422_s1, %s298_s30  ;;  %s29_s27 = int_to_ptr.vmem [resolvable:$true] %s28_s27 }
  0x15   :  { %p302_p9 = scmp.lt.u32.totalorder %s298_s30, %s422_s1 }
  0x17   :  { %p304_p10 = pnand %p302_p9, %p299_p8 }
  0x19   :  { %307 = shalt.err (!%p304_p10)
}
  0x1a   :  { %s308_s8 = scalar_lea.vmem %s29_s27, 2048  ;;  %p313_p12 = scmp.lt.s32.totalorder %s29_s27, %s29_s27 }
  0x1b   :  { %p309_p11 = scmp.ne.s32.totalorder %s29_s27, %s308_s8  ;;  %p314_p13 = scmp.lt.s32.totalorder %s308_s8, %s308_s8 }
  0x1d   :  { %p315_p0 = por %p314_p13, %p313_p12 }
  0x1f   :  { %p316_p1 = pnand %p315_p0, %p309_p11 }
  0x21   :  { %319 = shalt.err (!%p316_p1)
}
  0x22   :  { %34 = dma.hbm_to_vmem [thread:$0]  %s422_s1, 2048, %s29_s27, [#allocation6], %s349_s22, %s349_s22, %s350_s23  }
  0x23   :  { %342 = dma.done.wait [#allocation3], 256  }
  0x24   :  { %343 = vsyncadd [#allocation3], 4294967040 }
  0x25   :  { %344 = dma.done.wait [#allocation6], 2048  }
  0x26   :  { %345 = vsyncadd [#allocation6], 4294965248  ;;  %v53_v0 = vld [vmem:[#allocation5] sm:$0xff]  ;;  %v54_v1 = vld [vmem:[#allocation5 + $0x8] sm:$0xff]  ;;  %s352_s11 = smov [#allocation7]  }
  0x27   :  { %v55_v2 = vld [vmem:[#allocation5 + $0x10] sm:$0xff]  ;;  %v238_v3 = vpack.c.bf16 %v54_v1, %v53_v0  ;;  %v56_v4 = vld [vmem:[#allocation5 + $0x18] sm:$0xff]  ;;  %v57_v6 = vld [vmem:[#allocation5 + $0x20] sm:$0xff]  ;;  %s171_s12 = sshll.u32 %s352_s11, 4  ;;  %s172_s12 = int_to_ptr.vmem [resolvable:$true] %s171_s12 }
  0x28   :  { %v242_v5 = vpack.c.bf16 %v56_v4, %v55_v2  ;;  %v58_v7 = vld [vmem:[#allocation5 + $0x28] sm:$0xff]  ;;  %v51_v9 = vld [vmem:[#allocation2] sm:$0xff]  ;;  %v60_v11 = vld [vmem:[#allocation5 + $0x38] sm:$0xff]  ;;  %s320_s13 = scalar_lea.vmem %s172_s12, 256  ;;  %p325_p3 = scmp.lt.s32.totalorder %s172_s12, %s172_s12 }
  0x29   :  { %239 = vmatprep.subr.bf16.mxu0 %v238_v3  ;;  %v246_v8 = vpack.c.bf16 %v58_v7, %v57_v6  ;;  %v59_v10 = vld [vmem:[#allocation5 + $0x30] sm:$0xff]  ;;  %235 = vmatprep.mubr.f32.mxu0 %v51_v9  ;;  %v61_v13 = vld [vmem:[#allocation5 + $0x40] sm:$0xff]  ;;  %v62_v14 = vld [vmem:[#allocation5 + $0x48] sm:$0xff]  ;;  %p321_p2 = scmp.ne.s32.totalorder %s172_s12, %s320_s13  ;;  %p326_p4 = scmp.lt.s32.totalorder %s320_s13, %s320_s13 }
  0x2a   :  { %241 = vmatpush3.bf16.msra.mxu0 %v238_v3  ;;  %v250_v12 = vpack.c.bf16 %v60_v11, %v59_v10  ;;  %v254_v15 = vpack.c.bf16 %v62_v14, %v61_v13  ;;  %v63_v16 = vld [vmem:[#allocation5 + $0x50] sm:$0xff]  ;;  %v64_v17 = vld [vmem:[#allocation5 + $0x58] sm:$0xff]  ;;  %v65_v19 = vld [vmem:[#allocation5 + $0x60] sm:$0xff] }
  0x2b   :  { %243 = vmatprep.subr.bf16.mxu0 %v242_v5  ;;  %v258_v18 = vpack.c.bf16 %v64_v17, %v63_v16  ;;  %v66_v20 = vld [vmem:[#allocation5 + $0x68] sm:$0xff]  ;;  %v67_v22 = vld [vmem:[#allocation5 + $0x70] sm:$0xff]  ;;  %v68_v23 = vld [vmem:[#allocation5 + $0x78] sm:$0xff]  ;;  %p327_p5 = por %p326_p4, %p325_p3 }
  0x2c   :  { %v262_v21 = vpack.c.bf16 %v66_v20, %v65_v19  ;;  %v266_v24 = vpack.c.bf16 %v68_v23, %v67_v22  ;;  %v52_v25 = vld [vmem:[#allocation2 + $0x8] sm:$0xff]  ;;  %v184_v27 = vld [vmem:[%s423_s2] ss:$0 sm:$0xff] }
  0x2d   :  { %p328_p6 = pnand %p327_p5, %p321_p2 }
  0x2e   :  { %245 = vmatpush3.bf16.msra.mxu0 %v242_v5 }
  0x2f   :  { %247 = vmatprep.subr.bf16.mxu0 %v246_v8 }
  0x32   :  { %249 = vmatpush3.bf16.msra.mxu0 %v246_v8 }
  0x33   :  { %251 = vmatprep.subr.bf16.mxu0 %v250_v12 }
  0x36   :  { %253 = vmatpush3.bf16.msra.mxu0 %v250_v12 }
  0x37   :  { %255 = vmatprep.subr.bf16.mxu0 %v254_v15 }
  0x3a   :  { %257 = vmatpush3.bf16.msra.mxu0 %v254_v15 }
  0x3b   :  { %259 = vmatprep.subr.bf16.mxu0 %v258_v18 }
  0x3e   :  { %261 = vmatpush3.bf16.msra.mxu0 %v258_v18 }
  0x3f   :  { %263 = vmatprep.subr.bf16.mxu0 %v262_v21 }
  0x42   :  { %265 = vmatpush3.bf16.msra.mxu0 %v262_v21 }
  0x43   :  { %267 = vmatprep.subr.bf16.mxu0 %v266_v24 }
  0x46   :  { %269 = vmatpush3.bf16.msra.mxu0 %v266_v24 }
  0x49   :  { %236 = vmatmul.mubr.f32.vlgmr.msra.gmra.mrb[0].mxu0 %v52_v25 }
 0x11c   :  { %v237_v26 = vpop.f32.mrb[0].mxu0 }
 0x11d   :  { %v135_v28 = vpop.f32.mrb[1].mxu0  ;;  %v161_v29 = vadd.f32 %v237_v26, %v184_v27 }
 0x11e   :  { %v160_v30 = vadd.f32 %v184_v27, %v135_v28 }
 0x11f   :  { %v163_v31 = vmax.f32 %v161_v29, 0.0 }
 0x120   :  { %v162_v32 = vmax.f32 %v160_v30, 0.0 }
 0x121   :  { %165 = vst [vmem:[#allocation7 + $0x8] sm:$0xff] %v163_v31 }
 0x122   :  { %164 = vst [vmem:[#allocation7] sm:$0xff] %v162_v32 }
 0x123   :  { %331 = shalt.err (!%p328_p6)
}
 0x124   :  { %s332_s2 = scalar_lea.hbm %s424_s3, 256 }
 0x125   :  { %p333_p7 = scmp.ne.s32.totalorder %s424_s3, %s332_s2  ;;  %p336_p8 = scmp.lt.u32.totalorder %s332_s2, %s424_s3 }
 0x127   :  { %p338_p9 = pnand %p336_p8, %p333_p7 }
 0x129   :  { %341 = shalt.err (!%p338_p9)
}
 0x12a   :  { %177 = dma.vmem_to_hbm [thread:$0]  %s172_s12, 256, %s424_s3, [#allocation4], %s349_s22, %s349_s22, %s350_s23  }
 0x12b   :  { %346 = dma.done.wait [#allocation4], 256  }
 0x12c   :  { %347 = vsyncadd [#allocation4], 4294967040 }
 0x12d   :  { %181 = vsyncpa [#allocation3], 1 }
 0x12e   :  { %182 = vsyncpa [#allocation6], 1 }
 0x12f   :  { %183 = vsyncpa [#allocation4], 1 }

</bundles_post_ra>
